<compile_context>
chip_gen: v7x
topology: tpu7x:2x2x1
jax: 0.10.0
libtpu: 0.0.40
codegen_flags: <defaults>
</compile_context>

<pallas_src>
import jax
import jax.numpy as jnp
from jax import lax
from jax.experimental import pallas as pl
from jax.experimental.pallas import tpu as pltpu


def _round_up(x, m):
    return (x + m - 1) // m * m


def _padded_tile_bytes(shape, dtype):
    """VMEM bytes of one tile: last dim padded to 128 lanes, 2nd-last to the
    dtype's sublane packing (8 for f32, 16 for bf16, 32 for int8)."""
    itemsize = jnp.dtype(dtype).itemsize
    sub = max(8, 32 // itemsize)
    dims = list(shape)
    dims[-1] = _round_up(dims[-1], 128)
    if len(dims) >= 2:
        dims[-2] = _round_up(dims[-2], sub)
    n = 1
    for d in dims:
        n *= d
    return n * itemsize


def _convblock_kernel(w_ref, pb_ref, x_ref, o_ref):
    """One (batch, spatial-tile) grid step.

    w_ref:  (Cout, K)      BN-folded conv weight, K = Cin*k*k
    pb_ref: (Cout, 2)      col 0 = folded BN bias, col 1 = PReLU alpha (f32)
    x_ref:  (1, K, Mt)     im2col slab tile, spatial on lanes
    o_ref:  (1, Cout, Mt)  output tile, spatial on lanes (flattened NCHW)
    """
    # Single fused-tap matmul, f32 accumulation on the MXU.
    acc = jnp.dot(w_ref[...], x_ref[0], preferred_element_type=jnp.float32)
    bias = pb_ref[:, 0:1]                       # (Cout, 1), broadcasts on lanes
    alpha = pb_ref[:, 1:2]
    y = acc + bias
    y = jnp.where(y >= 0.0, y, alpha * y)       # PReLU
    o_ref[0] = y.astype(o_ref.dtype)


def convblock_forward(x, conv_w, bn_gamma, bn_beta, bn_mean, bn_var,
                      prelu_alpha, *, stride=2, padding=1, eps=1e-5,
                      compute_dtype=None, m_tile=512):
    """x: (B, Cin, H, W) NCHW; conv_w: (Cout, Cin, k, k). Returns NCHW output."""
    B, Cin, H, W = x.shape
    Cout, _, k, _ = conv_w.shape
    OH = (H + 2 * padding - k) // stride + 1
    OW = (W + 2 * padding - k) // stride + 1
    M = OH * OW
    K = Cin * k * k
    cdtype = jnp.dtype(compute_dtype) if compute_dtype is not None else x.dtype

    # ---- Fold BatchNorm (inference) into the conv weight + per-channel bias.
    scale = bn_gamma.astype(jnp.float32) / jnp.sqrt(bn_var.astype(jnp.float32) + eps)
    shift = bn_beta.astype(jnp.float32) - bn_mean.astype(jnp.float32) * scale
    w2d = (conv_w.astype(jnp.float32) * scale[:, None, None, None]
           ).reshape(Cout, K).astype(cdtype)                        # (Cout, K)
    alpha = jnp.broadcast_to(
        jnp.ravel(jnp.asarray(prelu_alpha, jnp.float32)), (Cout,))
    pb = jnp.stack([shift, alpha], axis=1)                          # (Cout, 2) f32

    # ---- im2col in (B, K, M) layout: K ordered (cin, kh, kw) to match the
    #      flattened weight; spatial M goes on lanes inside the kernel.
    x_p = jnp.pad(x, ((0, 0), (0, 0), (padding, padding), (padding, padding)))
    taps = [x_p[:, :, kh:kh + stride * (OH - 1) + 1:stride,
                      kw:kw + stride * (OW - 1) + 1:stride]
            for kh in range(k) for kw in range(k)]                  # (B,Cin,OH,OW)
    x_cols = jnp.stack(taps, axis=2).reshape(B, K, M).astype(cdtype)

    # ---- Spatial tiling of M (lane-aligned); pad M up to a tile multiple.
    if M > m_tile:
        Mt = m_tile                                   # multiple of 128
        M_pad = _round_up(M, Mt)
        if M_pad != M:
            x_cols = jnp.pad(x_cols, ((0, 0), (0, 0), (0, M_pad - M)))
    else:
        Mt, M_pad = M, M                              # single full-dim tile
    n_m = M_pad // Mt

    # ---- VMEM budget from padded tile shapes (double-buffered blocks + f32 acc),
    #      capped at 48 MiB so it also fits v7x's 64 MiB VMEM with headroom.
    vmem_bytes = (2 * _padded_tile_bytes((1, K, Mt), cdtype)
                  + 2 * _padded_tile_bytes((1, Cout, Mt), x.dtype)
                  + 2 * _padded_tile_bytes((Cout, K), cdtype)
                  + 2 * _padded_tile_bytes((Cout, 2), jnp.float32)
                  + _padded_tile_bytes((Cout, Mt), jnp.float32))
    vmem_limit = int(min(max(2 * vmem_bytes, 16 * 1024 * 1024),
                         48 * 1024 * 1024))

    out = pl.pallas_call(
        _convblock_kernel,
        out_shape=jax.ShapeDtypeStruct((B, Cout, M_pad), x.dtype),
        grid_spec=pltpu.PrefetchScalarGridSpec(
            num_scalar_prefetch=0,
            grid=(B, n_m),
            in_specs=[
                pl.BlockSpec((Cout, K), lambda b, m: (0, 0)),
                pl.BlockSpec((Cout, 2), lambda b, m: (0, 0)),
                pl.BlockSpec((1, K, Mt), lambda b, m: (b, 0, m)),
            ],
            out_specs=pl.BlockSpec((1, Cout, Mt), lambda b, m: (b, 0, m)),
        ),
        compiler_params=pltpu.CompilerParams(
            dimension_semantics=("parallel", "parallel"),
            vmem_limit_bytes=vmem_limit),
    )(w2d, pb, x_cols)

    # (B, Cout, M) is already flattened NCHW — just crop the M padding.
    return out[:, :, :M].reshape(B, Cout, OH, OW)


def convblock_reference(x, conv_w, bn_gamma, bn_beta, bn_mean, bn_var,
                        prelu_alpha, *, stride=2, padding=1, eps=1e-5):
    """Pure-JAX reference matching the PyTorch module (BN in eval mode)."""
    y = lax.conv_general_dilated(
        x, conv_w, window_strides=(stride, stride),
        padding=[(padding, padding), (padding, padding)],
        dimension_numbers=("NCHW", "OIHW", "NCHW"))
    inv = (bn_gamma / jnp.sqrt(bn_var + eps))[None, :, None, None]
    y = (y - bn_mean[None, :, None, None]) * inv + bn_beta[None, :, None, None]
    a = jnp.broadcast_to(jnp.ravel(jnp.asarray(prelu_alpha, jnp.float32)),
                         (y.shape[1],))
    return jnp.where(y >= 0, y, a[None, :, None, None] * y)


if __name__ == "__main__":
    key = jax.random.PRNGKey(0)
    kx, kw, kg, kb, km, kv = jax.random.split(key, 6)

    B, Cin, Cout, H, W, K = 2, 4, 8, 16, 16, 3
    x = jax.random.normal(kx, (B, Cin, H, W), jnp.float32)
    conv_w = jax.random.normal(kw, (Cout, Cin, K, K), jnp.float32) * 0.1
    bn_gamma = jax.random.uniform(kg, (Cout,), jnp.float32, 0.5, 1.5)
    bn_beta = jax.random.normal(kb, (Cout,), jnp.float32) * 0.1
    bn_mean = jax.random.normal(km, (Cout,), jnp.float32) * 0.1
    bn_var = jax.random.uniform(kv, (Cout,), jnp.float32, 0.5, 1.5)
    prelu_alpha = jnp.float32(0.25)          # nn.PReLU() default init

    ref = convblock_reference(
        x, conv_w, bn_gamma, bn_beta, bn_mean, bn_var, prelu_alpha)

    # f32 compute path (tight tolerance).
    out = jax.block_until_ready(convblock_forward(
        x, conv_w, bn_gamma, bn_beta, bn_mean, bn_var, prelu_alpha))
    assert out.shape == ref.shape, (out.shape, ref.shape)
    assert jnp.allclose(out, ref, atol=1e-5, rtol=1e-5), \
        float(jnp.max(jnp.abs(out - ref)))

    # bf16-on-MXU path (f32 accumulate) — looser tolerance.
    out_bf16 = jax.block_until_ready(convblock_forward(
        x, conv_w, bn_gamma, bn_beta, bn_mean, bn_var, prelu_alpha,
        compute_dtype=jnp.bfloat16))
    assert jnp.allclose(out_bf16, ref, atol=1e-1, rtol=1e-1), \
        float(jnp.max(jnp.abs(out_bf16 - ref)))

    print("KERNEL_OK")
</pallas_src>

<mosaic_0001>
module attributes {stable_mosaic.version = 11 : i64} {
  func.func @_convblock_kernel(%arg0: i32, %arg1: i32, %arg2: memref<8x36xf32, #tpu.memory_space<vmem>>, %arg3: memref<8x2xf32, #tpu.memory_space<vmem>>, %arg4: memref<1x36x64xf32, #tpu.memory_space<vmem>>, %arg5: memref<1x8x64xf32, #tpu.memory_space<vmem>>) attributes {dimension_semantics = [#tpu.dimension_semantics<parallel>, #tpu.dimension_semantics<parallel>], iteration_bounds = array<i64: 2, 1>, scalar_prefetch = 0 : i64, scratch_operands = 0 : i64, tpu.core_type = #tpu.core_type<tc>, window_params = [{pipeline_mode = #tpu.pipeline_mode<synchronous>, transform_indices = @transform_0, window_bounds = array<i64: 8, 36>}, {pipeline_mode = #tpu.pipeline_mode<synchronous>, transform_indices = @transform_1, window_bounds = array<i64: 8, 2>}, {transform_indices = @transform_2, window_bounds = array<i64: 1, 36, 64>}, {transform_indices = @transform_3, window_bounds = array<i64: 1, 8, 64>}]} {
    %c0 = arith.constant 0 : index
    %c0_0 = arith.constant 0 : index
    %0 = vector.load %arg2[%c0, %c0_0] : memref<8x36xf32, #tpu.memory_space<vmem>>, vector<8x36xf32>
    %c0_1 = arith.constant 0 : index
    %c0_2 = arith.constant 0 : index
    %c0_3 = arith.constant 0 : index
    %1 = vector.load %arg4[%c0_1, %c0_2, %c0_3] : memref<1x36x64xf32, #tpu.memory_space<vmem>>, vector<1x36x64xf32>
    %2 = vector.shape_cast %1 : vector<1x36x64xf32> to vector<36x64xf32>
    %cst = arith.constant dense<0.000000e+00> : vector<8x64xf32>
    %3 = tpu.matmul %0, %2, %cst {dimension_numbers = #tpu.dot_dimension_numbers<[1], [0], [0], [1], [0, 0, 1, 1], [], []>} : vector<8x36xf32>, vector<36x64xf32>, vector<8x64xf32> -> vector<8x64xf32>
    %c0_4 = arith.constant 0 : index
    %c0_5 = arith.constant 0 : index
    %4 = vector.load %arg3[%c0_4, %c0_5] : memref<8x2xf32, #tpu.memory_space<vmem>>, vector<8x1xf32>
    %c0_6 = arith.constant 0 : index
    %c1 = arith.constant 1 : index
    %5 = vector.load %arg3[%c0_6, %c1] : memref<8x2xf32, #tpu.memory_space<vmem>>, vector<8x1xf32>
    %6 = vector.broadcast %4 : vector<8x1xf32> to vector<8x64xf32>
    %7 = arith.addf %3, %6 : vector<8x64xf32>
    %cst_7 = arith.constant 0.000000e+00 : f32
    %8 = vector.broadcast %cst_7 : f32 to vector<8x64xf32>
    %9 = arith.cmpf oge, %7, %8 : vector<8x64xf32>
    %10 = vector.broadcast %5 : vector<8x1xf32> to vector<8x64xf32>
    %11 = arith.mulf %10, %7 : vector<8x64xf32>
    %12 = arith.select %9, %7, %11 : vector<8x64xi1>, vector<8x64xf32>
    %c0_8 = arith.constant 0 : index
    %c0_9 = arith.constant 0 : index
    %c0_10 = arith.constant 0 : index
    %13 = vector.load %arg5[%c0_8, %c0_9, %c0_10] : memref<1x8x64xf32, #tpu.memory_space<vmem>>, vector<1x8x64xf32>
    %14 = vector.shape_cast %13 : vector<1x8x64xf32> to vector<8x64xf32>
    %15 = vector.shape_cast %12 : vector<8x64xf32> to vector<1x8x64xf32>
    tpu.vector_store %arg5[%c0_8, %c0_9, %c0_10], %15 {strides = array<i32>} : memref<1x8x64xf32, #tpu.memory_space<vmem>>, vector<1x8x64xf32>,
    return
  }
  func.func @transform_0(%arg0: i32, %arg1: i32) -> (i32, i32) {
    %c0_i32 = arith.constant 0 : i32
    %c0_i32_0 = arith.constant 0 : i32
    %c0_i32_1 = arith.constant 0 : i32
    return %c0_i32, %c0_i32_0 : i32, i32
  }
  func.func @transform_1(%arg0: i32, %arg1: i32) -> (i32, i32) {
    %c0_i32 = arith.constant 0 : i32
    %c0_i32_0 = arith.constant 0 : i32
    %c0_i32_1 = arith.constant 0 : i32
    return %c0_i32, %c0_i32_0 : i32, i32
  }
  func.func @transform_2(%arg0: i32, %arg1: i32) -> (i32, i32, i32) {
    %c0_i32 = arith.constant 0 : i32
    %c0_i32_0 = arith.constant 0 : i32
    return %arg0, %c0_i32, %arg1 : i32, i32, i32
  }
  func.func @transform_3(%arg0: i32, %arg1: i32) -> (i32, i32, i32) {
    %c0_i32 = arith.constant 0 : i32
    %c0_i32_0 = arith.constant 0 : i32
    return %arg0, %c0_i32, %arg1 : i32, i32, i32
  }
}

</mosaic_0001>

<bundles_post_ra>
// kernel: tpu_custom_call.1
= control target key start
LH: loop header
LB: loop body
LE: loop exit
PB: predicated region body
PF: predicated region fallthrough
CT: control target
= control target key end

     0   :  { %8 = vsyncpa [#allocation3], 0  ;;  %s707_s0 = inlined_call_operand.vmem [shape: f32[8,36], index: 0, kind: input, shape index: {}]   ;;  %s708_s1 = inlined_call_operand.vmem [shape: f32[8,2], index: 1, kind: input, shape index: {}]   ;;  %s709_s2 = inlined_call_operand.vmem [shape: f32[2,36,64], index: 2, kind: input, shape index: {}]   ;;  %s710_s3 = inlined_call_operand.hbm [shape: f32[2,8,64], index: 3, kind: output, shape index: {}]  }
   0x1   :  { %10 = vsyncpa [#allocation3 + $0x1], 0  ;;  %s589_s12 = smov 0   ;;  %s591_s13 = smov 0  }
   0x2   :  { %s593_s14 = smov 0   ;;  %s595_s15 = smov 0  }
   0x3   :  { %s597_s16 = smov 0   ;;  %s599_s17 = smov 0  }
   0x4 LB: > { %s382_s18 = sadd.s32 4294967295, %s561_s17   ;;  %s383_s19 = sadd.s32 4294967294, %s561_s17   ;;  %s561_s17 = sphi %s599_s17, %s16_s17   ;;  %s557_s16 = sphi %s597_s16, %s717_s16   ;;  %s553_s15 = sphi %s595_s15, %s716_s15   ;;  %s549_s14 = sphi %s593_s14, %s715_s14   ;;  %s545_s13 = sphi %s591_s13, %s714_s13   ;;  %s541_s12 = sphi %s589_s12, %s713_s12  }
   0x5   : > { %s28_s20 = sadd.s32 1, %s557_s16  ;;  %s107_s21 = sadd.s32 1, %s549_s14 }
   0x6   : > { %p30_p0 = scmp.ge.s32.totalorder %s28_s20, 2  ;;  %p117_p1 = scmp.ne.s32.totalorder %s549_s14, %s545_s13 }
   0x7   : > { %p118_p2 = scmp.eq.s32.totalorder %s382_s18, 1  ;;  %p123_p3 = scmp.ne.s32.totalorder %s545_s13, %s541_s12 }
   0x8   : > { %s719_s20 = smov (%p30_p0, %s28_s20), 0  ;;  %p124_p5 = scmp.eq.s32.totalorder %s383_s19, 1 }
   0x9   : > { %p629_p4 = por %p118_p2, %p117_p1  ;;  %s102_s23 = ssub.s32 %s557_s16, %s719_s20 }
   0xa   : > { %p386_p6 = scmp.ge.s32.totalorder %s561_s17, 1  ;;  %p105_p7 = scmp.eq.s32.totalorder %s102_s23, 0 }
   0xb   : > { %p636_p8 = por %p124_p5, %p123_p3  ;;  %p159_p9 = scmp.lt.s32.totalorder %s561_s17, 3 }
   0xc   : > { %s642_s25 = scalar_select %p105_p7, %s549_s14, %s107_s21  }
   0xd   : > { %p160_p10 = pnand %p386_p6, %p159_p9 }
   0xe   : > { %p186_p11 = scmp.lt.s32.totalorder (!%p160_p10), %s553_s15, 1  ;;  %v563_v0 = vmov (!%p160_p10), 0.0|0.0   ;;  %vm564_vm0 = vmmov (!%p160_p10), 0   ;;  %v565_v1 = vmov (!%p160_p10), 0.0   ;;  %v200_v2 = vld [vmem:[%s708_s1] sm:$0xff] (!%p160_p10)  ;;  %v566_v3 = vmov (!%p160_p10), 0  }
   0xf   : > { %163 = sbr.rel (%p160_p10) target bundleno = 270 (0x10e), region = 32  ;;  %414 = vmatprep.subr.bf16.mxu0 (!%p160_p10), %v563_v0  ;;  %411 = vmatprep.mubr.msk.f32.mxu0 (!%p160_p10), %vm564_vm0, %v565_v1  ;;  %v567_v7 = vmov (!%p160_p10), 1   ;;  %vm210_vm1 = vcmask (!%p160_p10), 1043456   ;;  %v194_v12 = vld [vmem:[%s707_s0] sm:$0xff] (!%p160_p10)  ;;  %vm206_vm2 = vcmask (!%p160_p10), 293888   ;;  %s183_s8 = sand.u32 (!%p160_p10), 1, %s545_s13  }
  0x10   : > { %481 = vset.pattern.permute.xlu0 (!%p160_p10), %v566_v3  ;;  %s387_s9 = sshll.u32 (!%p160_p10), %s183_s8, 3  ;;  %s392_s10 = sshll.u32 (!%p160_p10), %s553_s15, 7  ;;  %vm291_vm4 = vcmask (!%p160_p10), 523264  }
  0x11   : > { %203 = vperm.xlu0 (!%p160_p10), %481, %v200_v2   ;;  %s185_s11 = scalar_lea.vmem (!%p160_p10), [#allocation2], %s387_s9  ;;  %s660_s23 = scalar_lea.hbm (!%p160_p10), %s710_s3, %s392_s10 }
  0x12   : > { %s308_s18 = sshll.u32 (!%p160_p10), %s185_s11, 4  ;;  %s294_s26 = scalar_lea.sflag (!%p160_p10), [#allocation3], %s183_s8  ;;  %s662_s18 = int_to_ptr.vmem [resolvable:$true] %s308_s18 }
  0x13   : > { %s483_s27 = scalar_lea.vmem (!%p160_p10), %s662_s18, 128 }
  0x14   : > { %p484_p12 = scmp.ne.s32.totalorder (!%p160_p10), %s662_s18, %s483_s27 }
  0x15   : > { %482 = vset.pattern.permute.xlu0 (!%p160_p10), %v567_v7 }
  0x16   : > { %s187_s28 = scalar_select %p186_p11, %s553_s15, 1  ;;  %286 = vperm.xlu0 %482, %v200_v2  }
  0x17   : > { %p485_p13 = pnand %p484_p12, %p629_p4  ;;  %s568_s15 = smov [#allocation2]  }
  0x18   : > { %s420_s29 = smul.u32 40, %s187_s28  ;;  %s487_s28 = sshll.u32 %s568_s15, 4  ;;  %s488_s28 = int_to_ptr.vmem [resolvable:$false] %s487_s28 }
  0x19   : > { %p486_p0 = pneg %p485_p13  ;;  %p490_p1 = scmp.lt.s32.totalorder %s662_s18, %s488_s28 }
  0x1a   : > { %s193_s5 = scalar_lea.vmem %s709_s2, %s420_s29  ;;  %s489_s29 = scalar_lea.vmem %s488_s28, 256 }
  0x1b   : > { %v195_v4 = vld [vmem:[%s193_s5] sm:$0xff]  ;;  %v196_v5 = vld [vmem:[%s193_s5 + $0x8] sm:$0xff]  ;;  %v197_v6 = vld [vmem:[%s193_s5 + $0x10] sm:$0xff]  ;;  %p491_p2 = scmp.lt.s32.totalorder %s489_s29, %s483_s27 }
  0x1c   : > { %v415_v8 = vpack.c.bf16 %v196_v5, %v195_v4  ;;  %v198_v9 = vld [vmem:[%s193_s5 + $0x18] sm:$0xff]  ;;  %v199_v11 = vld [vmem:[%s193_s5 + $0x20] sm:$0xf] }
  0x1d   : > { %v418_v10 = vpack.c.bf16 %v198_v9, %v197_v6  ;;  %p492_p3 = por %p491_p2, %p490_p1 }
  0x1e   : > { %416 = vmatpush3.bf16.msra.mxu0 %v415_v8 }
  0x1f   : > { %417 = vmatprep.subr.bf16.mxu0 %v563_v0  ;;  %p493_p5 = pnand %p492_p3, %p486_p0 }
  0x22   : > { %419 = vmatpush3.bf16.msra.mxu0 %v418_v10 }
  0x23   : > { %409 = vmatprep.subr.mxu0 %v565_v1 }
  0x26   : > { %410 = vmatpush3.msk.msra.mxu0 %vm210_vm1, %v199_v11 }
  0x27   : > { %412 = vmatmul.mubr.msk.f32.vlgmr.msra.gmra.mrb[0].mxu0 %vm206_vm2, %v194_v12 }
  0x90   : > { %v204_v13 = vpop.permute.xlu0 %203 }
  0x95   : > { %v287_v15 = vpop.permute.xlu0 %286 }
  0xfa   : > { %v280_v14 = vpop.f32.mrb[0].mxu0 }
  0xfb   : > { %v281_v16 = vadd.f32 %v280_v14, %v204_v13  ;;  %v413_v17 = vpop.f32.mrb[1].mxu0 }
  0xfd   : > { %vm284_vm3 = vcmp.ge.f32.partialorder %v281_v16, 0.0  ;;  %v289_v18 = vmul.f32 %v287_v15, %v281_v16 }
  0xff   : > { %v290_v19 = vsel %vm284_vm3, %v281_v16, %v289_v18 }
 0x100   : > { %292 = vst.msk [vmem:[%s185_s11] sm:$0xff] %vm291_vm4, %v290_v19 }
 0x101   : > { %496 = shalt.err (!%p493_p5)
}
 0x102   : > { %s497_s30 = scalar_lea.hbm %s660_s23, 128  ;;  %s501_s6 = scalar_lea.hbm %s710_s3, 256 }
 0x103   : > { %p498_p6 = scmp.ne.s32.totalorder %s660_s23, %s497_s30  ;;  %p502_p10 = scmp.lt.u32.totalorder %s660_s23, %s710_s3 }
 0x104   : > { %p503_p11 = scmp.lt.u32.totalorder %s501_s6, %s497_s30  ;;  %p505_p13 = scmp.lt.u32.totalorder %s497_s30, %s660_s23 }
 0x105   : > { %p499_p7 = pnand %p498_p6, %p629_p4 }
 0x106   : > { %p504_p12 = por %p503_p11, %p502_p10 }
 0x107   : > { %p500_p9 = pneg %p499_p7 }
 0x108   : > { %p506_p0 = por %p505_p13, %p504_p12 }
 0x10a   : > { %p507_p1 = pnand %p506_p0, %p500_p9 }
 0x10c   : > { %510 = shalt.err (!%p507_p1)
}
 0x10d   : > { %421 = dma.vmem_to_hbm [thread:$0]  (%p629_p4), %s662_s18, 128, %s660_s23, %s294_s26  }
 0x10e PF: > { %p427_p2 = scmp.ge.s32.totalorder %s561_s17, 2  ;;  %s320_s9 = sand.u32 1, %s541_s12  }
 0x10f   : > { %s321_s10 = scalar_lea.sflag [#allocation3], %s320_s9 }
 0x110   : > { %p424_p3 = pnand %p427_p2, %p636_p8 }
 0x112   : > { %536 = dma.done.wait (!%p424_p3), %s321_s10, 128  }
 0x113   : > { %538 = vsyncadd (!%p424_p3), %s321_s10, 4294967168  ;;  %s16_s17 = sadd.s32 1, %s561_s17   ;;  %s713_s12 = smov %s545_s13 }
 0x114   : > { %p13_p5 = scmp.ge.s32.totalorder %s16_s17, 4   ;;  %s714_s13 = smov %s549_s14 }
 0x115   : > { %s715_s14 = smov %s642_s25  ;;  %s716_s15 = smov %s557_s16 }
 0x116   : > { %s717_s16 = smov %s719_s20  ;;  %15 = sbr.rel (!%p13_p5) target bundleno = 4 (0x4), region = 67 }
 0x11d   :  { %326 = vsyncpa [#allocation3], 1 }
 0x11e   :  { %328 = vsyncpa [#allocation3 + $0x1], 1 }

</bundles_post_ra>
